<compile_context>
chip_gen: v6e
topology: v6e:2x2x1
jax: 0.10.0
libtpu: 0.0.40
codegen_flags: <defaults>
</compile_context>

<pallas_src>
import jax
import jax.numpy as jnp
from jax.experimental import pallas as pl
from jax.experimental.pallas import tpu as pltpu

EPS = 1e-5
NEG_SLOPE = 0.2
LANES = 128


def _stats_kernel(nv_ref, p_ref, x_ref, acc_ref):
    """Pass 1: accumulate per-channel sum / sum-of-squares of the conv output.

    nv_ref : SMEM (1,) int32   -- number of valid batch elements
    p_ref  : SMEM (16,) f32    -- [w00, w01, w10, w11, b0, b1, ...]
    x_ref  : VMEM (3, tr, 128) -- x[:,0], x[:,1], x[:,2] lane-dense tiles
    acc_ref: VMEM (4, tr, 128) -- resident accumulator [sum0, sum1, sq0, sq1]
    """
    @pl.when(pl.program_id(0) == 0)
    def _():
        acc_ref[...] = jnp.zeros_like(acc_ref)

    tr = x_ref.shape[1]
    w00 = p_ref[0]; w01 = p_ref[1]; w10 = p_ref[2]; w11 = p_ref[3]
    b0 = p_ref[4]; b1 = p_ref[5]

    xa = x_ref[0]; xb = x_ref[1]; xc = x_ref[2]          # (tr, 128) each

    # Validity mask for the padded batch tail (generated in-kernel, no HBM read).
    row_ids = jax.lax.broadcasted_iota(jnp.int32, (tr, LANES), 0)
    lane_ids = jax.lax.broadcasted_iota(jnp.int32, (tr, LANES), 1)
    gidx = (pl.program_id(0) * tr + row_ids) * LANES + lane_ids
    m = (gidx < nv_ref[0]).astype(jnp.float32)

    # Conv1d(1, 2, k=2): channel c, output position t.
    z0 = m * (w00 * xa + w01 * xb + b0)                  # c0, t0
    z1 = m * (w00 * xb + w01 * xc + b0)                  # c0, t1
    z2 = m * (w10 * xa + w11 * xb + b1)                  # c1, t0
    z3 = m * (w10 * xb + w11 * xc + b1)                  # c1, t1

    acc_ref[0] += z0 + z1                                # sum,   channel 0
    acc_ref[1] += z2 + z3                                # sum,   channel 1
    acc_ref[2] += z0 * z0 + z1 * z1                      # sumsq, channel 0
    acc_ref[3] += z2 * z2 + z3 * z3                      # sumsq, channel 1


def _apply_kernel(p_ref, x_ref, o_ref):
    """Pass 2: BN-folded conv + LeakyReLU + Linear + Sigmoid (pure elementwise).

    p_ref : SMEM (16,) f32 -- [w00',w01',w10',w11', b0',b1', lw0..lw3, lb, ...]
    x_ref : VMEM (3, tr, 128)
    o_ref : VMEM (tr, 128)
    """
    w00 = p_ref[0]; w01 = p_ref[1]; w10 = p_ref[2]; w11 = p_ref[3]
    b0 = p_ref[4]; b1 = p_ref[5]
    lw0 = p_ref[6]; lw1 = p_ref[7]; lw2 = p_ref[8]; lw3 = p_ref[9]
    lb = p_ref[10]

    xa = x_ref[0]; xb = x_ref[1]; xc = x_ref[2]          # (tr, 128)

    # Conv with BatchNorm affine folded into weights/bias.
    z0 = w00 * xa + w01 * xb + b0
    z1 = w00 * xb + w01 * xc + b0
    z2 = w10 * xa + w11 * xb + b1
    z3 = w10 * xb + w11 * xc + b1

    # LeakyReLU(0.2)
    z0 = jnp.where(z0 >= 0, z0, NEG_SLOPE * z0)
    z1 = jnp.where(z1 >= 0, z1, NEG_SLOPE * z1)
    z2 = jnp.where(z2 >= 0, z2, NEG_SLOPE * z2)
    z3 = jnp.where(z3 >= 0, z3, NEG_SLOPE * z3)

    # Linear(4, 1) + Sigmoid; PyTorch flatten order is [c0t0, c0t1, c1t0, c1t1].
    logits = lw0 * z0 + lw1 * z1 + lw2 * z2 + lw3 * z3 + lb
    o_ref[...] = jax.nn.sigmoid(logits)


def discriminator_forward(x_ncl, params, *, tile_rows=512):
    """x_ncl: (N, 1, 3) float32 (PyTorch NCL layout). Returns (N, 1) float32."""
    x = x_ncl[:, 0, :].astype(jnp.float32)               # (N, 3)
    n = x.shape[0]

    # ---- lane-dense layout: (N, 3) -> (3, rows, 128), rows a multiple of tile.
    rows = -(-n // LANES)                                # ceil(N / 128)
    rows = max(8, -(-rows // 8) * 8)                     # sublane multiple of 8
    tr = min(tile_rows, rows)                            # tile rows (>= 8)
    rows = -(-rows // tr) * tr                           # rows multiple of tr
    n_pad = rows * LANES
    grid = rows // tr

    xp = jnp.pad(x, ((0, n_pad - n), (0, 0)))            # (n_pad, 3)
    xl = xp.T.reshape(3, rows, LANES)                    # (3, rows, 128)

    cw = params["conv_w"].astype(jnp.float32)            # (2, 2)
    cb = params["conv_b"].astype(jnp.float32).reshape(-1)
    gamma = params["gamma"].astype(jnp.float32).reshape(-1)
    beta = params["beta"].astype(jnp.float32).reshape(-1)
    lw = params["lin_w"].astype(jnp.float32).reshape(-1)
    lb = params["lin_b"].astype(jnp.float32).reshape(-1)

    smem = pl.BlockSpec(memory_space=pltpu.MemorySpace.SMEM)

    # ------------------ pass 1: batch statistics of the conv output ----------
    nv = jnp.array([n], dtype=jnp.int32)
    p1 = jnp.concatenate([cw.reshape(-1), cb, jnp.zeros(10, jnp.float32)])  # (16,)

    stats = pl.pallas_call(
        _stats_kernel,
        out_shape=jax.ShapeDtypeStruct((4, tr, LANES), jnp.float32),
        grid=(grid,),
        in_specs=[smem, smem,
                  pl.BlockSpec((3, tr, LANES), lambda i: (0, i, 0))],
        out_specs=pl.BlockSpec((4, tr, LANES), lambda i: (0, 0, 0)),
        compiler_params=pltpu.CompilerParams(
            dimension_semantics=("arbitrary",)),
    )(nv, p1, xl)

    s = stats.sum(axis=(1, 2))                            # [sum0, sum1, sq0, sq1]
    cnt = jnp.float32(2 * n)                              # per-channel count (N * L_out)
    mean = s[:2] / cnt
    var = s[2:] / cnt - mean * mean                       # biased (training-mode BN)
    scale = gamma * jax.lax.rsqrt(var + EPS)
    shift = beta - mean * scale

    # Fold BN affine into the conv weights/bias (LeakyReLU stays elementwise).
    wf = cw * scale[:, None]                              # (2, 2)
    bf = cb * scale + shift                               # (2,)

    # ------------------ pass 2: normalize + LeakyReLU + Linear + Sigmoid -----
    p2 = jnp.concatenate([wf.reshape(-1), bf, lw, lb,
                          jnp.zeros(5, jnp.float32)])     # (16,)

    out = pl.pallas_call(
        _apply_kernel,
        out_shape=jax.ShapeDtypeStruct((rows, LANES), jnp.float32),
        grid=(grid,),
        in_specs=[smem,
                  pl.BlockSpec((3, tr, LANES), lambda i: (0, i, 0))],
        out_specs=pl.BlockSpec((tr, LANES), lambda i: (i, 0)),
        compiler_params=pltpu.CompilerParams(
            dimension_semantics=("parallel",)),
    )(p2, xl)

    return out.reshape(n_pad)[:n].reshape(n, 1)


def init_params(key):
    """Deterministic init mimicking PyTorch default uniform bounds."""
    k1, k2, k3, k4 = jax.random.split(key, 4)
    conv_bound = 1.0 / jnp.sqrt(2.0)   # fan_in = in_ch(1) * k(2)
    lin_bound = 1.0 / jnp.sqrt(4.0)    # fan_in = 4
    return {
        "conv_w": jax.random.uniform(k1, (2, 2), jnp.float32, -conv_bound, conv_bound),
        "conv_b": jax.random.uniform(k2, (1, 2), jnp.float32, -conv_bound, conv_bound),
        "gamma":  jnp.ones((1, 2), jnp.float32),
        "beta":   jnp.zeros((1, 2), jnp.float32),
        "lin_w":  jax.random.uniform(k3, (1, 4), jnp.float32, -lin_bound, lin_bound),
        "lin_b":  jax.random.uniform(k4, (1, 1), jnp.float32, -lin_bound, lin_bound),
    }


def reference_forward(x_ncl, params):
    """Pure-JAX reference replicating the PyTorch module (training-mode BN)."""
    cw = params["conv_w"]              # (out_ch=2, k=2)
    cb = params["conv_b"][0]           # (2,)
    xs = x_ncl[:, 0, :]                # (N, 3)
    y = jnp.stack(
        [jnp.stack([cw[c, 0] * xs[:, t] + cw[c, 1] * xs[:, t + 1] + cb[c]
                    for t in range(2)], axis=-1) for c in range(2)],
        axis=1)                        # (N, 2, 2)
    mean = y.mean(axis=(0, 2), keepdims=True)
    var = ((y - mean) ** 2).mean(axis=(0, 2), keepdims=True)
    yn = (y - mean) / jnp.sqrt(var + EPS)
    yn = yn * params["gamma"][0][None, :, None] + params["beta"][0][None, :, None]
    yl = jnp.where(yn >= 0, yn, NEG_SLOPE * yn)
    flat = yl.reshape(-1, 4)
    logits = flat @ params["lin_w"].T + params["lin_b"][0]
    return jax.nn.sigmoid(logits)      # (N, 1)


if __name__ == "__main__":
    key = jax.random.PRNGKey(0)
    kx, kp = jax.random.split(key)
    params = init_params(kp)

    # Small odd batch: exercises tail masking within a single tile.
    n1 = 300
    x1 = jax.random.normal(kx, (n1, 1, 3), dtype=jnp.float32)   # PyTorch NCL input
    out1 = jax.block_until_ready(discriminator_forward(x1, params))
    ref1 = reference_forward(x1, params)
    assert out1.shape == (n1, 1)
    assert jnp.allclose(out1, ref1, atol=1e-4, rtol=1e-4), (out1[:4], ref1[:4])

    # Larger batch with small tiles: exercises the multi-tile cross-grid BN
    # reduction ("arbitrary" accumulator) and the "parallel" apply pass.
    n2 = 3000
    x2 = jax.random.normal(jax.random.fold_in(kx, 1), (n2, 1, 3), dtype=jnp.float32)
    out2 = jax.block_until_ready(discriminator_forward(x2, params, tile_rows=8))
    ref2 = reference_forward(x2, params)
    assert out2.shape == (n2, 1)
    assert jnp.allclose(out2, ref2, atol=1e-4, rtol=1e-4), (out2[:4], ref2[:4])

    # TODO(synk): BatchNorm1d running_mean/running_var updates (training-side
    # state mutation) are not modeled; only the forward output is reproduced.
    print("KERNEL_OK")
</pallas_src>

<mosaic_0001>
module attributes {stable_mosaic.version = 11 : i64} {
  func.func @_stats_kernel(%arg0: i32, %arg1: memref<1xi32, #tpu.memory_space<smem>>, %arg2: memref<16xf32, #tpu.memory_space<smem>>, %arg3: memref<3x8x128xf32, #tpu.memory_space<vmem>>, %arg4: memref<4x8x128xf32, #tpu.memory_space<vmem>>) attributes {dimension_semantics = [#tpu.dimension_semantics<arbitrary>], iteration_bounds = array<i64: 1>, scalar_prefetch = 0 : i64, scratch_operands = 0 : i64, tpu.core_type = #tpu.core_type<tc>, window_params = [{transform_indices = @transform_0, window_bounds = array<i64: 1>}, {transform_indices = @transform_1, window_bounds = array<i64: 16>}, {transform_indices = @transform_2, window_bounds = array<i64: 3, 8, 128>}, {pipeline_mode = #tpu.pipeline_mode<synchronous>, transform_indices = @transform_3, window_bounds = array<i64: 4, 8, 128>}]} {
    %c0_i32 = arith.constant 0 : i32
    %0 = arith.cmpi eq, %arg0, %c0_i32 : i32
    %1 = arith.extui %0 : i1 to i32
    %c0_i32_0 = arith.constant 0 : i32
    %2 = arith.cmpi ne, %1, %c0_i32_0 : i32
    scf.if %2 {
      %cst = arith.constant 0.000000e+00 : f32
      %92 = vector.broadcast %cst : f32 to vector<4x8x128xf32>
      %c0_35 = arith.constant 0 : index
      %c0_36 = arith.constant 0 : index
      %c0_37 = arith.constant 0 : index
      %93 = vector.load %arg4[%c0_35, %c0_36, %c0_37] : memref<4x8x128xf32, #tpu.memory_space<vmem>>, vector<4x8x128xf32>
      tpu.vector_store %arg4[%c0_35, %c0_36, %c0_37], %92 {strides = array<i32>} : memref<4x8x128xf32, #tpu.memory_space<vmem>>, vector<4x8x128xf32>,
    } else {
    }
    %c0 = arith.constant 0 : index
    %3 = memref.load %arg2[%c0] : memref<16xf32, #tpu.memory_space<smem>>
    %c1 = arith.constant 1 : index
    %4 = memref.load %arg2[%c1] : memref<16xf32, #tpu.memory_space<smem>>
    %c2 = arith.constant 2 : index
    %5 = memref.load %arg2[%c2] : memref<16xf32, #tpu.memory_space<smem>>
    %c3 = arith.constant 3 : index
    %6 = memref.load %arg2[%c3] : memref<16xf32, #tpu.memory_space<smem>>
    %c4 = arith.constant 4 : index
    %7 = memref.load %arg2[%c4] : memref<16xf32, #tpu.memory_space<smem>>
    %c5 = arith.constant 5 : index
    %8 = memref.load %arg2[%c5] : memref<16xf32, #tpu.memory_space<smem>>
    %c0_1 = arith.constant 0 : index
    %c0_2 = arith.constant 0 : index
    %c0_3 = arith.constant 0 : index
    %9 = vector.load %arg3[%c0_1, %c0_2, %c0_3] : memref<3x8x128xf32, #tpu.memory_space<vmem>>, vector<1x8x128xf32>
    %10 = vector.shape_cast %9 : vector<1x8x128xf32> to vector<8x128xf32>
    %c1_4 = arith.constant 1 : index
    %c0_5 = arith.constant 0 : index
    %c0_6 = arith.constant 0 : index
    %11 = vector.load %arg3[%c1_4, %c0_5, %c0_6] : memref<3x8x128xf32, #tpu.memory_space<vmem>>, vector<1x8x128xf32>
    %12 = vector.shape_cast %11 : vector<1x8x128xf32> to vector<8x128xf32>
    %c2_7 = arith.constant 2 : index
    %c0_8 = arith.constant 0 : index
    %c0_9 = arith.constant 0 : index
    %13 = vector.load %arg3[%c2_7, %c0_8, %c0_9] : memref<3x8x128xf32, #tpu.memory_space<vmem>>, vector<1x8x128xf32>
    %14 = vector.shape_cast %13 : vector<1x8x128xf32> to vector<8x128xf32>
    %15 = tpu.iota {dimensions = array<i32: 0>} : vector<8x128xi32>
    %16 = tpu.iota {dimensions = array<i32: 1>} : vector<8x128xi32>
    %c8_i32 = arith.constant 8 : i32
    %17 = arith.muli %arg0, %c8_i32 : i32
    %18 = vector.broadcast %17 : i32 to vector<8x128xi32>
    %19 = arith.addi %18, %15 : vector<8x128xi32>
    %c128_i32 = arith.constant 128 : i32
    %20 = vector.broadcast %c128_i32 : i32 to vector<8x128xi32>
    %21 = arith.muli %19, %20 : vector<8x128xi32>
    %22 = arith.addi %21, %16 : vector<8x128xi32>
    %c0_10 = arith.constant 0 : index
    %23 = memref.load %arg1[%c0_10] : memref<1xi32, #tpu.memory_space<smem>>
    %24 = vector.broadcast %23 : i32 to vector<8x128xi32>
    %25 = arith.cmpi slt, %22, %24 : vector<8x128xi32>
    %26 = arith.extui %25 : vector<8x128xi1> to vector<8x128xi32>
    %27 = arith.sitofp %26 : vector<8x128xi32> to vector<8x128xf32>
    %28 = vector.broadcast %3 : f32 to vector<8x128xf32>
    %29 = arith.mulf %28, %10 : vector<8x128xf32>
    %30 = vector.broadcast %4 : f32 to vector<8x128xf32>
    %31 = arith.mulf %30, %12 : vector<8x128xf32>
    %32 = arith.addf %29, %31 : vector<8x128xf32>
    %33 = vector.broadcast %7 : f32 to vector<8x128xf32>
    %34 = arith.addf %32, %33 : vector<8x128xf32>
    %35 = arith.mulf %27, %34 : vector<8x128xf32>
    %36 = vector.broadcast %3 : f32 to vector<8x128xf32>
    %37 = arith.mulf %36, %12 : vector<8x128xf32>
    %38 = vector.broadcast %4 : f32 to vector<8x128xf32>
    %39 = arith.mulf %38, %14 : vector<8x128xf32>
    %40 = arith.addf %37, %39 : vector<8x128xf32>
    %41 = vector.broadcast %7 : f32 to vector<8x128xf32>
    %42 = arith.addf %40, %41 : vector<8x128xf32>
    %43 = arith.mulf %27, %42 : vector<8x128xf32>
    %44 = vector.broadcast %5 : f32 to vector<8x128xf32>
    %45 = arith.mulf %44, %10 : vector<8x128xf32>
    %46 = vector.broadcast %6 : f32 to vector<8x128xf32>
    %47 = arith.mulf %46, %12 : vector<8x128xf32>
    %48 = arith.addf %45, %47 : vector<8x128xf32>
    %49 = vector.broadcast %8 : f32 to vector<8x128xf32>
    %50 = arith.addf %48, %49 : vector<8x128xf32>
    %51 = arith.mulf %27, %50 : vector<8x128xf32>
    %52 = vector.broadcast %5 : f32 to vector<8x128xf32>
    %53 = arith.mulf %52, %12 : vector<8x128xf32>
    %54 = vector.broadcast %6 : f32 to vector<8x128xf32>
    %55 = arith.mulf %54, %14 : vector<8x128xf32>
    %56 = arith.addf %53, %55 : vector<8x128xf32>
    %57 = vector.broadcast %8 : f32 to vector<8x128xf32>
    %58 = arith.addf %56, %57 : vector<8x128xf32>
    %59 = arith.mulf %27, %58 : vector<8x128xf32>
    %c0_11 = arith.constant 0 : index
    %c0_12 = arith.constant 0 : index
    %c0_13 = arith.constant 0 : index
    %60 = vector.load %arg4[%c0_11, %c0_12, %c0_13] : memref<4x8x128xf32, #tpu.memory_space<vmem>>, vector<1x8x128xf32>
    %61 = vector.shape_cast %60 : vector<1x8x128xf32> to vector<8x128xf32>
    %62 = arith.addf %35, %43 : vector<8x128xf32>
    %63 = arith.addf %61, %62 : vector<8x128xf32>
    %c0_14 = arith.constant 0 : index
    %c0_15 = arith.constant 0 : index
    %c0_16 = arith.constant 0 : index
    %64 = vector.load %arg4[%c0_14, %c0_15, %c0_16] : memref<4x8x128xf32, #tpu.memory_space<vmem>>, vector<1x8x128xf32>
    %65 = vector.shape_cast %64 : vector<1x8x128xf32> to vector<8x128xf32>
    %66 = vector.shape_cast %63 : vector<8x128xf32> to vector<1x8x128xf32>
    tpu.vector_store %arg4[%c0_14, %c0_15, %c0_16], %66 {strides = array<i32>} : memref<4x8x128xf32, #tpu.memory_space<vmem>>, vector<1x8x128xf32>,
    %c1_17 = arith.constant 1 : index
    %c0_18 = arith.constant 0 : index
    %c0_19 = arith.constant 0 : index
    %67 = vector.load %arg4[%c1_17, %c0_18, %c0_19] : memref<4x8x128xf32, #tpu.memory_space<vmem>>, vector<1x8x128xf32>
    %68 = vector.shape_cast %67 : vector<1x8x128xf32> to vector<8x128xf32>
    %69 = arith.addf %51, %59 : vector<8x128xf32>
    %70 = arith.addf %68, %69 : vector<8x128xf32>
    %c1_20 = arith.constant 1 : index
    %c0_21 = arith.constant 0 : index
    %c0_22 = arith.constant 0 : index
    %71 = vector.load %arg4[%c1_20, %c0_21, %c0_22] : memref<4x8x128xf32, #tpu.memory_space<vmem>>, vector<1x8x128xf32>
    %72 = vector.shape_cast %71 : vector<1x8x128xf32> to vector<8x128xf32>
    %73 = vector.shape_cast %70 : vector<8x128xf32> to vector<1x8x128xf32>
    tpu.vector_store %arg4[%c1_20, %c0_21, %c0_22], %73 {strides = array<i32>} : memref<4x8x128xf32, #tpu.memory_space<vmem>>, vector<1x8x128xf32>,
    %c2_23 = arith.constant 2 : index
    %c0_24 = arith.constant 0 : index
    %c0_25 = arith.constant 0 : index
    %74 = vector.load %arg4[%c2_23, %c0_24, %c0_25] : memref<4x8x128xf32, #tpu.memory_space<vmem>>, vector<1x8x128xf32>
    %75 = vector.shape_cast %74 : vector<1x8x128xf32> to vector<8x128xf32>
    %76 = arith.mulf %35, %35 : vector<8x128xf32>
    %77 = arith.mulf %43, %43 : vector<8x128xf32>
    %78 = arith.addf %76, %77 : vector<8x128xf32>
    %79 = arith.addf %75, %78 : vector<8x128xf32>
    %c2_26 = arith.constant 2 : index
    %c0_27 = arith.constant 0 : index
    %c0_28 = arith.constant 0 : index
    %80 = vector.load %arg4[%c2_26, %c0_27, %c0_28] : memref<4x8x128xf32, #tpu.memory_space<vmem>>, vector<1x8x128xf32>
    %81 = vector.shape_cast %80 : vector<1x8x128xf32> to vector<8x128xf32>
    %82 = vector.shape_cast %79 : vector<8x128xf32> to vector<1x8x128xf32>
    tpu.vector_store %arg4[%c2_26, %c0_27, %c0_28], %82 {strides = array<i32>} : memref<4x8x128xf32, #tpu.memory_space<vmem>>, vector<1x8x128xf32>,
    %c3_29 = arith.constant 3 : index
    %c0_30 = arith.constant 0 : index
    %c0_31 = arith.constant 0 : index
    %83 = vector.load %arg4[%c3_29, %c0_30, %c0_31] : memref<4x8x128xf32, #tpu.memory_space<vmem>>, vector<1x8x128xf32>
    %84 = vector.shape_cast %83 : vector<1x8x128xf32> to vector<8x128xf32>
    %85 = arith.mulf %51, %51 : vector<8x128xf32>
    %86 = arith.mulf %59, %59 : vector<8x128xf32>
    %87 = arith.addf %85, %86 : vector<8x128xf32>
    %88 = arith.addf %84, %87 : vector<8x128xf32>
    %c3_32 = arith.constant 3 : index
    %c0_33 = arith.constant 0 : index
    %c0_34 = arith.constant 0 : index
    %89 = vector.load %arg4[%c3_32, %c0_33, %c0_34] : memref<4x8x128xf32, #tpu.memory_space<vmem>>, vector<1x8x128xf32>
    %90 = vector.shape_cast %89 : vector<1x8x128xf32> to vector<8x128xf32>
    %91 = vector.shape_cast %88 : vector<8x128xf32> to vector<1x8x128xf32>
    tpu.vector_store %arg4[%c3_32, %c0_33, %c0_34], %91 {strides = array<i32>} : memref<4x8x128xf32, #tpu.memory_space<vmem>>, vector<1x8x128xf32>,
    return
  }
  func.func @transform_0(%arg0: i32) -> i32 {
    %c0_i32 = arith.constant 0 : i32
    %c0_i32_0 = arith.constant 0 : i32
    return %c0_i32 : i32
  }
  func.func @transform_1(%arg0: i32) -> i32 {
    %c0_i32 = arith.constant 0 : i32
    %c0_i32_0 = arith.constant 0 : i32
    return %c0_i32 : i32
  }
  func.func @transform_2(%arg0: i32) -> (i32, i32, i32) {
    %c0_i32 = arith.constant 0 : i32
    %c0_i32_0 = arith.constant 0 : i32
    %c0_i32_1 = arith.constant 0 : i32
    return %c0_i32, %arg0, %c0_i32_0 : i32, i32, i32
  }
  func.func @transform_3(%arg0: i32) -> (i32, i32, i32) {
    %c0_i32 = arith.constant 0 : i32
    %c0_i32_0 = arith.constant 0 : i32
    %c0_i32_1 = arith.constant 0 : i32
    %c0_i32_2 = arith.constant 0 : i32
    return %c0_i32, %c0_i32_0, %c0_i32_1 : i32, i32, i32
  }
}

</mosaic_0001>

<bundles_post_ra>
// kernel: tpu_custom_call.1
= control target key start
LH: loop header
LB: loop body
LE: loop exit
PB: predicated region body
PF: predicated region fallthrough
CT: control target
= control target key end

     0   :  { %9 = vsyncpa [#allocation6], 0  ;;  %s260_s0 = inlined_call_operand.<no memory space> [shape: s32[1], index: 0, kind: input, shape index: {}]   ;;  %s261_s1 = inlined_call_operand.vmem [shape: f32[16], index: 1, kind: input, shape index: {}]   ;;  %s262_s2 = inlined_call_operand.hbm [shape: f32[3,8,128], index: 2, kind: input, shape index: {}]   ;;  %s263_s3 = inlined_call_operand.hbm [shape: f32[4,8,128], index: 3, kind: output, shape index: {}]  }
   0x1   :  { %10 = vsyncpa [#allocation4], 0 }
   0x2   :  { %11 = vsyncpa [#allocation5], 0  ;;  %s20_s14 = sshll.u32 %s261_s1, 4  ;;  %s21_s14 = int_to_ptr.vmem [resolvable:$true] %s20_s14 }
   0x3   :  { %s155_s15 = scalar_lea.vmem %s21_s14, 16  ;;  %p160_p1 = scmp.lt.s32.totalorder %s21_s14, %s21_s14 }
   0x4   :  { %p156_p0 = scmp.ne.s32.totalorder %s21_s14, %s155_s15  ;;  %p161_p2 = scmp.lt.s32.totalorder %s155_s15, %s155_s15 }
   0x6   :  { %p162_p3 = por %p161_p2, %p160_p1 }
   0x8   :  { %p163_p4 = pnand %p162_p3, %p156_p0 }
   0xa   :  { %166 = shalt.err (!%p163_p4)
}
   0xb   :  { %s213_s16 = smov [#allocation3]   ;;  %s214_s17 = smov [#allocation7]  }
   0xc   :  { %23 = dma.vmem_to_smem %s21_s14, 16, %s213_s16, [#allocation6]  }
   0xd   :  { %s29_s18 = sshll.u32 %s214_s17, 4  ;;  %s30_s18 = int_to_ptr.vmem [resolvable:$true] %s29_s18 }
   0xe   :  { %s175_s19 = scalar_lea.vmem %s30_s18, 384  ;;  %p180_p6 = scmp.lt.s32.totalorder %s30_s18, %s30_s18 }
   0xf   :  { %p176_p5 = scmp.ne.s32.totalorder %s30_s18, %s175_s19  ;;  %p181_p7 = scmp.lt.s32.totalorder %s175_s19, %s175_s19 }
  0x11   :  { %p182_p8 = por %p181_p7, %p180_p6 }
  0x13   :  { %p183_p9 = pnand %p182_p8, %p176_p5 }
  0x15   :  { %186 = shalt.err (!%p183_p9)
}
  0x16   :  { %s215_s1 = smov 128   ;;  %s216_s20 = smov 8  }
  0x17   :  { %35 = dma.hbm_to_vmem [thread:$0]  %s262_s2, 384, %s30_s18, [#allocation4], %s215_s1, %s215_s1, %s216_s20  }
  0x18   :  { %207 = dma.done.wait [#allocation6], 16  }
  0x19   :  { %208 = vsyncadd [#allocation6], 4294967280 }
  0x1a   :  { %209 = dma.done.wait [#allocation4], 384  }
  0x1b   :  { %210 = vsyncadd [#allocation4], 4294966912 }
  0x1c   :  { %42 = sfence }
  0x1d   :  { %s51_s23 = sld [smem:[#allocation3]]  ;;  %v62_v0 = vlaneseq  ;;  %v57_v3 = vld [vmem:[#allocation7] sm:$0xff]  ;;  %v59_v4 = vld [vmem:[#allocation7 + $0x8] sm:$0xff]  ;;  %v61_v6 = vld [vmem:[#allocation7 + $0x10] sm:$0xff]  ;;  %v72_v7 = vstv %s260_s0  ;;  %v217_v21 = vmov 0.0   ;;  %s218_s0 = smov [#allocation8]  }
  0x1e   :  { %s143_s24 = sld [smem:[#allocation3 + $0x1]]  ;;  %s130_s30 = sshll.u32 %s218_s0, 4  ;;  %s131_s30 = int_to_ptr.vmem [resolvable:$true] %s130_s30 }
  0x1f   :  { %s248_s25 = sld [smem:[#allocation3 + $0x4]]  ;;  %v63_v1 = vshrl.u32 %v62_v0, 7  ;;  %v65_v2 = vand.u32 127, %v62_v0  ;;  %s187_s4 = scalar_lea.vmem %s131_s30, 512 }
  0x20   :  { %s144_s26 = sld [smem:[#allocation3 + $0x2]]  ;;  %p188_p10 = scmp.ne.s32.totalorder %s131_s30, %s187_s4 }
  0x21   :  { %v69_v5 = vmul.u32 128, %v63_v1  ;;  %s145_s27 = sld [smem:[#allocation3 + $0x3]]  ;;  %p192_p11 = scmp.lt.s32.totalorder %s131_s30, %s131_s30 }
  0x22   :  { %s147_s29 = sld [smem:[#allocation3 + $0x5]]  ;;  %p193_p12 = scmp.lt.s32.totalorder %s187_s4, %s187_s4 }
  0x23   :  { %v70_v8 = vadd.s32 %v69_v5, %v65_v2  ;;  %v76_v9 = vstv %s51_s23 }
  0x24   :  { %v77_v10 = vmul.f32 %v76_v9, %v57_v3  ;;  %v78_v11 = vstv %s143_s24  ;;  %v84_v12 = vmul.f32 %v76_v9, %v59_v4  ;;  %p194_p13 = por %p193_p12, %p192_p11 }
  0x25   :  { %vm73_vm0 = vcmp.lt.s32.totalorder %v70_v8, %v72_v7  ;;  %v79_v13 = vmul.f32 %v78_v11, %v59_v4  ;;  %v85_v14 = vmul.f32 %v78_v11, %v61_v6  ;;  %v81_v15 = vstv %s248_s25 }
  0x26   :  { %v89_v16 = vstv %s144_s26  ;;  %v148_v22 = vsel %vm73_vm0, 1.0, %v217_v21  ;;  %p195_p0 = pnand %p194_p13, %p188_p10 }
  0x27   :  { %v80_v17 = vadd.f32 %v79_v13, %v77_v10  ;;  %v86_v18 = vadd.f32 %v85_v14, %v84_v12  ;;  %v90_v19 = vmul.f32 %v89_v16, %v57_v3  ;;  %v91_v20 = vstv %s145_s27 }
  0x28   :  { %v92_v23 = vmul.f32 %v91_v20, %v59_v4  ;;  %v97_v24 = vmul.f32 %v89_v16, %v59_v4  ;;  %v98_v25 = vmul.f32 %v91_v20, %v61_v6  ;;  %v94_v28 = vstv %s147_s29 }
  0x29   :  { %v82_v26 = vadd.f32 %v81_v15, %v80_v17  ;;  %v87_v27 = vadd.f32 %v86_v18, %v81_v15 }
  0x2a   :  { %v93_v29 = vadd.f32 %v92_v23, %v90_v19  ;;  %v99_v30 = vadd.f32 %v98_v25, %v97_v24 }
  0x2b   :  { %v83_v31 = vmul.f32 %v148_v22, %v82_v26  ;;  %v88_v32 = vmul.f32 %v148_v22, %v87_v27 }
  0x2c   :  { %v95_v33 = vadd.f32 %v94_v28, %v93_v29  ;;  %v100_v34 = vadd.f32 %v99_v30, %v94_v28 }
  0x2d   :  { %v103_v35 = vadd.f32 %v88_v32, %v83_v31  ;;  %v113_v36 = vmul.f32 %v83_v31, %v83_v31  ;;  %v114_v37 = vmul.f32 %v88_v32, %v88_v32 }
  0x2e   :  { %v96_v38 = vmul.f32 %v148_v22, %v95_v33  ;;  %v101_v39 = vmul.f32 %v148_v22, %v100_v34 }
  0x2f   :  { %v115_v40 = vadd.f32 %v114_v37, %v113_v36  ;;  %105 = vst [vmem:[#allocation8] sm:$0xff] %v103_v35 }
  0x30   :  { %v108_v41 = vadd.f32 %v101_v39, %v96_v38  ;;  %v120_v42 = vmul.f32 %v96_v38, %v96_v38  ;;  %v121_v43 = vmul.f32 %v101_v39, %v101_v39 }
  0x31   :  { %117 = vst [vmem:[#allocation8 + $0x10] sm:$0xff] %v115_v40 }
  0x32   :  { %v122_v44 = vadd.f32 %v121_v43, %v120_v42  ;;  %110 = vst [vmem:[#allocation8 + $0x8] sm:$0xff] %v108_v41 }
  0x34   :  { %124 = vst [vmem:[#allocation8 + $0x18] sm:$0xff] %v122_v44 }
  0x35   :  { %198 = shalt.err (!%p195_p0)
}
  0x36   :  { %136 = dma.vmem_to_hbm [thread:$0]  %s131_s30, 512, %s263_s3, [#allocation5], %s215_s1, %s215_s1, %s216_s20  }
  0x37   :  { %211 = dma.done.wait [#allocation5], 512  }
  0x38   :  { %212 = vsyncadd [#allocation5], 4294966784 }
  0x39   :  { %140 = vsyncpa [#allocation4], 1 }
  0x3a   :  { %141 = vsyncpa [#allocation5], 1 }
  0x3b   :  { %142 = vsyncpa [#allocation6], 1 }

</bundles_post_ra>
